<compile_context>
chip_gen: v7x
topology: tpu7x:2x2x1
jax: 0.10.0
libtpu: 0.0.40
codegen_flags: <defaults>
</compile_context>

<pallas_src>
import functools

import jax
import jax.numpy as jnp
from jax.experimental import pallas as pl
from jax.experimental.pallas import tpu as pltpu

# Logical sizes (match torch nn.Linear dims).
IN, H1, H2, OUT = 784, 120, 84, 10
# Lane-aligned (multiple-of-128) padded feature sizes. K of layer 1 stays 784.
H1_P, H2_P, OUT_P = 128, 128, 128

TILE_B_MAX = 2048  # rows per grid step; ~14 MiB VMEM at f32 x, fits everywhere


def _round_up(x, m):
    return ((x + m - 1) // m) * m


def _pad_to(a, shape, dtype):
    pads = [(0, t - s) for s, t in zip(a.shape, shape)]
    return jnp.pad(a.astype(dtype), pads)


def mlp_kernel(x_ref, w1_ref, b1_ref, w2_ref, b2_ref, w3_ref, b3_ref, o_ref):
    # Cast x in-kernel (avoids a separate wrapper-side pad/cast HBM pass).
    x = x_ref[...].astype(jnp.bfloat16)
    # Layer 1: (tile_b, 784) @ (784, 128) -> f32 acc, +bias, ReLU, back to bf16.
    h1 = jnp.dot(x, w1_ref[...], preferred_element_type=jnp.float32)
    h1 = jnp.maximum(h1 + b1_ref[...], 0.0).astype(jnp.bfloat16)
    # Layer 2: (tile_b, 128) @ (128, 128)
    h2 = jnp.dot(h1, w2_ref[...], preferred_element_type=jnp.float32)
    h2 = jnp.maximum(h2 + b2_ref[...], 0.0).astype(jnp.bfloat16)
    # Layer 3: (tile_b, 128) @ (128, 128) -> lane-dense logits slab (bf16 store).
    out = jnp.dot(h2, w3_ref[...], preferred_element_type=jnp.float32)
    o_ref[...] = (out + b3_ref[...]).astype(o_ref.dtype)


@functools.partial(jax.jit, static_argnames=("tile_b_max",))
def mnist_mlp_forward(x, packed_params, tile_b_max=TILE_B_MAX):
    """x: (B, 1, 28, 28) float32 (NCHW, like PyTorch). Returns (B, 10) float32."""
    w1, b1, w2, b2, w3, b3 = packed_params
    B = x.shape[0]
    x_flat = x.reshape(B, -1)  # torch.flatten(x, start_dim=1) -> (B, 784), no copy

    # Batch tile: multiple of 8 sublanes, capped at tile_b_max, and chosen so
    # large batches get >= 4 grid steps (v7x megacore sharding of "parallel").
    b8 = _round_up(max(B, 1), 8)
    tile_b = max(8, min(tile_b_max, _round_up(pl.cdiv(b8, 4), 8)))
    grid = (pl.cdiv(B, tile_b),)

    const = lambda i: (0, 0)
    in_specs = [
        pl.BlockSpec((tile_b, IN), lambda i: (i, 0)),   # x streams (f32, unpadded)
        pl.BlockSpec((IN, H1_P), const),                # resident weights/biases
        pl.BlockSpec((1, H1_P), const),
        pl.BlockSpec((H1_P, H2_P), const),
        pl.BlockSpec((1, H2_P), const),
        pl.BlockSpec((H2_P, OUT_P), const),
        pl.BlockSpec((1, OUT_P), const),
    ]
    out_spec = pl.BlockSpec((tile_b, OUT_P), lambda i: (i, 0))

    flops = 2 * B * (IN * H1_P + H1_P * H2_P + H2_P * OUT_P)
    bytes_accessed = (
        B * IN * 4                                        # x (f32, read once)
        + (IN * H1_P + H1_P * H2_P + H2_P * OUT_P) * 2    # weights (bf16)
        + (H1_P + H2_P + OUT_P) * 4                       # biases (f32)
        + B * OUT_P * 2                                   # output (bf16)
    )

    out_padded = pl.pallas_call(
        mlp_kernel,
        out_shape=jax.ShapeDtypeStruct((B, OUT_P), jnp.bfloat16),
        grid=grid,
        in_specs=in_specs,
        out_specs=out_spec,
        compiler_params=pltpu.CompilerParams(
            dimension_semantics=("parallel",),
            vmem_limit_bytes=32 * 1024 * 1024,
        ),
        cost_estimate=pl.CostEstimate(
            flops=flops, transcendentals=0, bytes_accessed=bytes_accessed),
    )(x_flat, w1, b1, w2, b2, w3, b3)

    # TODO(synk): if a softmax/argmax/loss consumer exists, fuse it into the
    # kernel instead of materializing this slice.
    return out_padded[:, :OUT].astype(jnp.float32)


def init_params(key):
    """Deterministic init matching nn.Linear shapes.

    torch Linear(in, out) has weight (out, in), bias (out,). We store the
    transposed weight (in, out) and bias as (1, out), using PyTorch's default
    uniform(-1/sqrt(in), 1/sqrt(in)) init.
    """
    dims = [(IN, H1), (H1, H2), (H2, OUT)]
    params = []
    for fan_in, fan_out in dims:
        key, kw, kb = jax.random.split(key, 3)
        bound = 1.0 / jnp.sqrt(fan_in)
        w = jax.random.uniform(kw, (fan_in, fan_out), jnp.float32, -bound, bound)
        b = jax.random.uniform(kb, (1, fan_out), jnp.float32, -bound, bound)
        params += [w, b]
    return tuple(params)


def pack_params(params):
    """One-time pad (lane-align to 128) + cast of weights/biases for the kernel.

    Zero padding is numerically exact: padded x columns meet zero weight rows,
    padded hidden units get zero bias so relu(0)=0 contributes nothing.
    """
    w1, b1, w2, b2, w3, b3 = params
    return (
        _pad_to(w1, (IN, H1_P), jnp.bfloat16),
        _pad_to(b1, (1, H1_P), jnp.float32),
        _pad_to(w2, (H1_P, H2_P), jnp.bfloat16),
        _pad_to(b2, (1, H2_P), jnp.float32),
        _pad_to(w3, (H2_P, OUT_P), jnp.bfloat16),
        _pad_to(b3, (1, OUT_P), jnp.float32),
    )


def reference_forward(x, params):
    w1, b1, w2, b2, w3, b3 = params
    h = x.reshape(x.shape[0], -1)
    h = jnp.maximum(h @ w1 + b1, 0.0)
    h = jnp.maximum(h @ w2 + b2, 0.0)
    return h @ w3 + b3


if __name__ == "__main__":
    key = jax.random.PRNGKey(0)
    key, kx = jax.random.split(key)

    # Small MNIST-shaped batch: (B=2, C=1, H=28, W=28) NCHW.
    x = jax.random.normal(kx, (2, 1, 28, 28), jnp.float32)
    params = init_params(key)
    packed = jax.block_until_ready(pack_params(params))  # done once, outside jit

    out = mnist_mlp_forward(x, packed)
    out = jax.block_until_ready(out)

    ref = reference_forward(x, params)  # full f32 reference
    assert out.shape == (2, 10)
    # bf16 operands / bf16 output slab (f32 accumulation) vs f32 reference.
    assert jnp.allclose(out, ref, atol=5e-2, rtol=5e-2), (
        f"max abs err {jnp.max(jnp.abs(out - ref))}")

    print("KERNEL_OK")
</pallas_src>

<mosaic_0001>
module attributes {stable_mosaic.version = 11 : i64} {
  func.func @mlp_kernel(%arg0: i32, %arg1: memref<8x784xf32, #tpu.memory_space<vmem>>, %arg2: memref<784x128xbf16, #tpu.memory_space<vmem>>, %arg3: memref<1x128xf32, #tpu.memory_space<vmem>>, %arg4: memref<128x128xbf16, #tpu.memory_space<vmem>>, %arg5: memref<1x128xf32, #tpu.memory_space<vmem>>, %arg6: memref<128x128xbf16, #tpu.memory_space<vmem>>, %arg7: memref<1x128xf32, #tpu.memory_space<vmem>>, %arg8: memref<8x128xbf16, #tpu.memory_space<vmem>>) attributes {dimension_semantics = [#tpu.dimension_semantics<parallel>], iteration_bounds = array<i64: 1>, scalar_prefetch = 0 : i64, scratch_operands = 0 : i64, tpu.core_type = #tpu.core_type<tc>, window_params = [{transform_indices = @transform_0, window_bounds = array<i64: 8, 784>}, {pipeline_mode = #tpu.pipeline_mode<synchronous>, transform_indices = @transform_1, window_bounds = array<i64: 784, 128>}, {pipeline_mode = #tpu.pipeline_mode<synchronous>, transform_indices = @transform_2, window_bounds = array<i64: 1, 128>}, {pipeline_mode = #tpu.pipeline_mode<synchronous>, transform_indices = @transform_3, window_bounds = array<i64: 128, 128>}, {pipeline_mode = #tpu.pipeline_mode<synchronous>, transform_indices = @transform_4, window_bounds = array<i64: 1, 128>}, {pipeline_mode = #tpu.pipeline_mode<synchronous>, transform_indices = @transform_5, window_bounds = array<i64: 128, 128>}, {pipeline_mode = #tpu.pipeline_mode<synchronous>, transform_indices = @transform_6, window_bounds = array<i64: 1, 128>}, {transform_indices = @transform_7, window_bounds = array<i64: 8, 128>}]} {
    %c0 = arith.constant 0 : index
    %c0_0 = arith.constant 0 : index
    %0 = vector.load %arg1[%c0, %c0_0] : memref<8x784xf32, #tpu.memory_space<vmem>>, vector<8x784xf32>
    %1 = arith.truncf %0 : vector<8x784xf32> to vector<8x784xbf16>
    %c0_1 = arith.constant 0 : index
    %c0_2 = arith.constant 0 : index
    %2 = vector.load %arg2[%c0_1, %c0_2] : memref<784x128xbf16, #tpu.memory_space<vmem>>, vector<784x128xbf16>
    %cst = arith.constant dense<0.000000e+00> : vector<8x128xf32>
    %3 = tpu.matmul %1, %2, %cst {dimension_numbers = #tpu.dot_dimension_numbers<[1], [0], [0], [1], [0, 0, 1, 1], [], []>} : vector<8x784xbf16>, vector<784x128xbf16>, vector<8x128xf32> -> vector<8x128xf32>
    %c0_3 = arith.constant 0 : index
    %c0_4 = arith.constant 0 : index
    %4 = vector.load %arg3[%c0_3, %c0_4] : memref<1x128xf32, #tpu.memory_space<vmem>>, vector<1x128xf32>
    %5 = vector.broadcast %4 : vector<1x128xf32> to vector<8x128xf32>
    %6 = arith.addf %3, %5 : vector<8x128xf32>
    %cst_5 = arith.constant 0.000000e+00 : f32
    %7 = vector.broadcast %cst_5 : f32 to vector<8x128xf32>
    %8 = arith.maximumf %6, %7 : vector<8x128xf32>
    %9 = arith.truncf %8 : vector<8x128xf32> to vector<8x128xbf16>
    %c0_6 = arith.constant 0 : index
    %c0_7 = arith.constant 0 : index
    %10 = vector.load %arg4[%c0_6, %c0_7] : memref<128x128xbf16, #tpu.memory_space<vmem>>, vector<128x128xbf16>
    %cst_8 = arith.constant dense<0.000000e+00> : vector<8x128xf32>
    %11 = tpu.matmul %9, %10, %cst_8 {dimension_numbers = #tpu.dot_dimension_numbers<[1], [0], [0], [1], [0, 0, 1, 1], [], []>} : vector<8x128xbf16>, vector<128x128xbf16>, vector<8x128xf32> -> vector<8x128xf32>
    %c0_9 = arith.constant 0 : index
    %c0_10 = arith.constant 0 : index
    %12 = vector.load %arg5[%c0_9, %c0_10] : memref<1x128xf32, #tpu.memory_space<vmem>>, vector<1x128xf32>
    %13 = vector.broadcast %12 : vector<1x128xf32> to vector<8x128xf32>
    %14 = arith.addf %11, %13 : vector<8x128xf32>
    %cst_11 = arith.constant 0.000000e+00 : f32
    %15 = vector.broadcast %cst_11 : f32 to vector<8x128xf32>
    %16 = arith.maximumf %14, %15 : vector<8x128xf32>
    %17 = arith.truncf %16 : vector<8x128xf32> to vector<8x128xbf16>
    %c0_12 = arith.constant 0 : index
    %c0_13 = arith.constant 0 : index
    %18 = vector.load %arg6[%c0_12, %c0_13] : memref<128x128xbf16, #tpu.memory_space<vmem>>, vector<128x128xbf16>
    %cst_14 = arith.constant dense<0.000000e+00> : vector<8x128xf32>
    %19 = tpu.matmul %17, %18, %cst_14 {dimension_numbers = #tpu.dot_dimension_numbers<[1], [0], [0], [1], [0, 0, 1, 1], [], []>} : vector<8x128xbf16>, vector<128x128xbf16>, vector<8x128xf32> -> vector<8x128xf32>
    %c0_15 = arith.constant 0 : index
    %c0_16 = arith.constant 0 : index
    %20 = vector.load %arg7[%c0_15, %c0_16] : memref<1x128xf32, #tpu.memory_space<vmem>>, vector<1x128xf32>
    %21 = vector.broadcast %20 : vector<1x128xf32> to vector<8x128xf32>
    %22 = arith.addf %19, %21 : vector<8x128xf32>
    %23 = arith.truncf %22 : vector<8x128xf32> to vector<8x128xbf16>
    %c0_17 = arith.constant 0 : index
    %c0_18 = arith.constant 0 : index
    %24 = vector.load %arg8[%c0_17, %c0_18] : memref<8x128xbf16, #tpu.memory_space<vmem>>, vector<8x128xbf16>
    tpu.vector_store %arg8[%c0_17, %c0_18], %23 {strides = array<i32>} : memref<8x128xbf16, #tpu.memory_space<vmem>>, vector<8x128xbf16>,
    return
  }
  func.func @transform_0(%arg0: i32) -> (i32, i32) {
    %c0_i32 = arith.constant 0 : i32
    %c0_i32_0 = arith.constant 0 : i32
    return %arg0, %c0_i32 : i32, i32
  }
  func.func @transform_1(%arg0: i32) -> (i32, i32) {
    %c0_i32 = arith.constant 0 : i32
    %c0_i32_0 = arith.constant 0 : i32
    %c0_i32_1 = arith.constant 0 : i32
    return %c0_i32, %c0_i32_0 : i32, i32
  }
  func.func @transform_2(%arg0: i32) -> (i32, i32) {
    %c0_i32 = arith.constant 0 : i32
    %c0_i32_0 = arith.constant 0 : i32
    %c0_i32_1 = arith.constant 0 : i32
    return %c0_i32, %c0_i32_0 : i32, i32
  }
  func.func @transform_3(%arg0: i32) -> (i32, i32) {
    %c0_i32 = arith.constant 0 : i32
    %c0_i32_0 = arith.constant 0 : i32
    %c0_i32_1 = arith.constant 0 : i32
    return %c0_i32, %c0_i32_0 : i32, i32
  }
  func.func @transform_4(%arg0: i32) -> (i32, i32) {
    %c0_i32 = arith.constant 0 : i32
    %c0_i32_0 = arith.constant 0 : i32
    %c0_i32_1 = arith.constant 0 : i32
    return %c0_i32, %c0_i32_0 : i32, i32
  }
  func.func @transform_5(%arg0: i32) -> (i32, i32) {
    %c0_i32 = arith.constant 0 : i32
    %c0_i32_0 = arith.constant 0 : i32
    %c0_i32_1 = arith.constant 0 : i32
    return %c0_i32, %c0_i32_0 : i32, i32
  }
  func.func @transform_6(%arg0: i32) -> (i32, i32) {
    %c0_i32 = arith.constant 0 : i32
    %c0_i32_0 = arith.constant 0 : i32
    %c0_i32_1 = arith.constant 0 : i32
    return %c0_i32, %c0_i32_0 : i32, i32
  }
  func.func @transform_7(%arg0: i32) -> (i32, i32) {
    %c0_i32 = arith.constant 0 : i32
    %c0_i32_0 = arith.constant 0 : i32
    return %arg0, %c0_i32 : i32, i32
  }
}

</mosaic_0001>

<bundles_post_ra>
// kernel: mnist_mlp_forward.1
= control target key start
LH: loop header
LB: loop body
LE: loop exit
PB: predicated region body
PF: predicated region fallthrough
CT: control target
= control target key end

     0   :  { %12 = vsyncpa [#allocation3], 0  ;;  %s1316_s24 = smov [#allocation2]   ;;  %s1497_s0 = inlined_call_operand.vmem [shape: f32[2,784], index: 0, kind: input, shape index: {}]   ;;  %s1498_s1 = inlined_call_operand.hbm [shape: bf16[784,128], index: 1, kind: input, shape index: {}]   ;;  %s1499_s2 = inlined_call_operand.vmem [shape: f32[1,128], index: 2, kind: input, shape index: {}]   ;;  %s1500_s3 = inlined_call_operand.vmem [shape: bf16[128,128], index: 3, kind: input, shape index: {}]   ;;  %s1501_s4 = inlined_call_operand.vmem [shape: f32[1,128], index: 4, kind: input, shape index: {}]   ;;  %s1502_s5 = inlined_call_operand.vmem [shape: bf16[128,128], index: 5, kind: input, shape index: {}]   ;;  %s1503_s6 = inlined_call_operand.vmem [shape: f32[1,128], index: 6, kind: input, shape index: {}]   ;;  %s1504_s7 = inlined_call_operand.vmem [shape: bf16[2,128], index: 7, kind: output, shape index: {}]  }
   0x1   :  { %s20_s25 = sshll.u32 %s1316_s24, 4  ;;  %s1292_s28 = scalar_lea.hbm %s1498_s1, 6272  ;;  %s21_s25 = int_to_ptr.vmem [resolvable:$true] %s20_s25 }
   0x2   :  { %p1293_p0 = scmp.ne.s32.totalorder %s1498_s1, %s1292_s28  ;;  %p1296_p1 = scmp.lt.u32.totalorder %s1292_s28, %s1498_s1 }
   0x4   :  { %p1298_p2 = pnand %p1296_p1, %p1293_p0 }
   0x6   :  { %1301 = shalt.err (!%p1298_p2)
}
   0x7   :  { %s1302_s10 = scalar_lea.vmem %s21_s25, 6272  ;;  %p1307_p4 = scmp.lt.s32.totalorder %s21_s25, %s21_s25 }
   0x8   :  { %p1303_p3 = scmp.ne.s32.totalorder %s21_s25, %s1302_s10  ;;  %p1308_p5 = scmp.lt.s32.totalorder %s1302_s10, %s1302_s10 }
   0xa   :  { %p1309_p6 = por %p1308_p5, %p1307_p4 }
   0xc   :  { %p1310_p7 = pnand %p1309_p6, %p1303_p3 }
   0xe   :  { %1313 = shalt.err (!%p1310_p7)
}
   0xf   :  { %s1317_s11 = smov 64   ;;  %s1318_s12 = smov 4  }
  0x10   :  { %26 = dma.hbm_to_vmem [thread:$0]  %s1498_s1, 6272, %s21_s25, [#allocation3], %s1317_s11, %s1317_s11, %s1318_s12  }
  0x11   :  { %1314 = dma.done.wait [#allocation3], 6272  }
  0x12   :  { %1315 = vsyncadd [#allocation3], 4294961024  ;;  %v1215_v0 = vld [vmem:[#allocation2 + $0x40] sm:$0xff]   ;;  %v1219_v4 = vld [vmem:[#allocation2 + $0x48] sm:$0xff]   ;;  %v1319_v23 = vmov 1983009808   ;;  %v64_v25 = vlaneseq }
  0x13   :  { %v1216_v1 = vld [vmem:[#allocation2] sm:$0xff]   ;;  %1076 = vmatprep.subr.bf16.mxu0 %v1215_v0  ;;  %v1220_v5 = vld [vmem:[#allocation2 + $0x8] sm:$0xff]   ;;  %v1223_v8 = vld [vmem:[#allocation2 + $0x50] sm:$0xff]   ;;  %v62_v24 = vunpack.c.l.s4 %v1319_v23  ;;  %v1320_v47 = vmov 0.0   ;;  %vm1321_vm0 = vmmov 0   ;;  %vm541_vm1 = vcmask 130048  }
  0x14   :  { %v1217_v2 = vld [vmem:[#allocation2 + $0xc0] sm:$0xff]   ;;  %1077 = vmatpush3.bf16.msra.mxu0 %v1216_v1  ;;  %v1221_v6 = vld [vmem:[#allocation2 + $0xc8] sm:$0xff]   ;;  %v1224_v9 = vld [vmem:[#allocation2 + $0x10] sm:$0xff]   ;;  %v1375_v31 = vshrl.u32 %v64_v25, 7 }
  0x15   :  { %v1218_v3 = vld [vmem:[#allocation2 + $0x80] sm:$0xff]   ;;  %1098 = vmatprep.subr.bf16.mxu1 %v1217_v2  ;;  %1078 = vmatprep.subr.bf16.mxu0 %v1219_v4  ;;  %v1222_v7 = vld [vmem:[#allocation2 + $0x88] sm:$0xff]   ;;  %v1225_v10 = vld [vmem:[#allocation2 + $0xd0] sm:$0xff]   ;;  %v63_v30 = vunpack.c.0.s8 %v62_v24 }
  0x16   :  { %1099 = vmatpush3.bf16.msra.mxu1 %v1218_v3  ;;  %v1226_v11 = vld [vmem:[#allocation2 + $0x90] sm:$0xff]   ;;  %v1227_v12 = vld [vmem:[#allocation2 + $0x58] sm:$0xff]   ;;  %v1231_v16 = vld [vmem:[#allocation2 + $0x60] sm:$0xff]  }
  0x17   :  { %1100 = vmatprep.subr.bf16.mxu1 %v1221_v6  ;;  %v1228_v13 = vld [vmem:[#allocation2 + $0x18] sm:$0xff]   ;;  %v1232_v17 = vld [vmem:[#allocation2 + $0x20] sm:$0xff]   ;;  %v1235_v20 = vld [vmem:[#allocation2 + $0x68] sm:$0xff]   ;;  %v1378_v36 = vsub.s32 %v63_v30, %v1375_v31 }
  0x18   :  { %1079 = vmatpush3.bf16.msra.mxu0 %v1220_v5  ;;  %v1229_v14 = vld [vmem:[#allocation2 + $0xd8] sm:$0xff]   ;;  %v1233_v18 = vld [vmem:[#allocation2 + $0xe0] sm:$0xff]   ;;  %v1236_v21 = vld [vmem:[#allocation2 + $0x28] sm:$0xff]  }
  0x19   :  { %1080 = vmatprep.subr.bf16.mxu0 %v1223_v8  ;;  %v1230_v15 = vld [vmem:[#allocation2 + $0x98] sm:$0xff]   ;;  %v1234_v19 = vld [vmem:[#allocation2 + $0xa0] sm:$0xff]   ;;  %v1237_v22 = vld [vmem:[#allocation2 + $0xe8] sm:$0xff]  }
  0x1a   :  { %1101 = vmatpush3.bf16.msra.mxu1 %v1222_v7  ;;  %v1238_v26 = vld [vmem:[#allocation2 + $0xa8] sm:$0xff]   ;;  %v1239_v27 = vld [vmem:[#allocation2 + $0x70] sm:$0xff]   ;;  %v1243_v33 = vld [vmem:[#allocation2 + $0x78] sm:$0xff]  }
  0x1b   :  { %1102 = vmatprep.subr.bf16.mxu1 %v1225_v10  ;;  %v1240_v28 = vld [vmem:[#allocation2 + $0x30] sm:$0xff]   ;;  %v1244_v34 = vld [vmem:[#allocation2 + $0x38] sm:$0xff]   ;;  %v1251_v42 = vld [vmem:[#allocation2 + $0x140] sm:$0xff]  }
  0x1c   :  { %1081 = vmatpush3.bf16.msra.mxu0 %v1224_v9  ;;  %v1241_v29 = vld [vmem:[#allocation2 + $0xf0] sm:$0xff]   ;;  %v1245_v35 = vld [vmem:[#allocation2 + $0xf8] sm:$0xff]   ;;  %v1254_v52 = vld [vmem:[#allocation2 + $0x100] sm:$0xff]  }
  0x1d   :  { %1082 = vmatprep.subr.bf16.mxu0 %v1227_v12  ;;  %v1242_v32 = vld [vmem:[#allocation2 + $0xb0] sm:$0xff]   ;;  %v1248_v38 = vld [vmem:[%s1497_s0 + $0x1c] ss:$14 sps:$4 sm:$0xff]   ;;  %v1261_v63 = vld [vmem:[#allocation2 + $0x160] sm:$0xff]  }
  0x1e   :  { %1103 = vmatpush3.bf16.msra.mxu1 %v1226_v11  ;;  %v1246_v37 = vld [vmem:[%s1497_s0] ss:$14 sps:$4 sm:$0xff]   ;;  %v1250_v39 = vld [vmem:[#allocation2 + $0xb8] sm:$0xff]   ;;  %v81_v41 = vrot.slane %v1248_v38, %v1378_v36  ;;  %v1252_v43 = vld [vmem:[%s1497_s0 + $0x4] ss:$14 sps:$4 sm:$0xff]  }
  0x1f   :  { %1104 = vmatprep.subr.bf16.mxu1 %v1229_v14  ;;  %v67_v40 = vrot.slane %v1246_v37, %v1378_v36  ;;  %v1253_v44 = vld [vmem:[%s1497_s0 + $0x20] ss:$14 sps:$4 sm:$0xff]   ;;  %v74_v48 = vrot.slane %v1252_v43, %v1378_v36  ;;  %v1259_v61 = vld [vmem:[#allocation2 + $0x158] sm:$0xff]   ;;  %v1273_v5 = vld [vmem:[%s1497_s0 + $0x24] ss:$14 sps:$4 sm:$0xff]  }
  0x20   :  { %1083 = vmatpush3.bf16.msra.mxu0 %v1228_v13  ;;  %v88_v49 = vrot.slane %v1253_v44, %v1378_v36  ;;  %v1255_v55 = vld [vmem:[#allocation2 + $0x148] sm:$0xff]   ;;  %v1257_v59 = vld [vmem:[#allocation2 + $0x150] sm:$0xff]   ;;  %v1260_v62 = vld [vmem:[#allocation2 + $0x118] sm:$0xff]   ;;  %v117_v10 = vrot.slane %v1273_v5, %v1378_v36 }
  0x21   :  { %1084 = vmatprep.subr.bf16.mxu0 %v1231_v16  ;;  %v90_v45 = vcombine.high %v67_v40, %v81_v41  ;;  %v89_v46 = vcombine.low %v67_v40, %v81_v41  ;;  %v1256_v58 = vld [vmem:[#allocation2 + $0x108] sm:$0xff]   ;;  %v1258_v60 = vld [vmem:[#allocation2 + $0x110] sm:$0xff]   ;;  %v1269_v0 = vld [vmem:[#allocation2 + $0x180] sm:$0xff]  }
  0x22   :  { %1105 = vmatpush3.bf16.msra.mxu1 %v1230_v15  ;;  %v92_v53 = vcombine.high %v74_v48, %v88_v49  ;;  %v91_v54 = vcombine.low %v74_v48, %v88_v49  ;;  %v1262_v1 = vld [vmem:[#allocation2 + $0x120] sm:$0xff]   ;;  %v1270_v2 = vld [vmem:[%s1497_s0 + $0x8] ss:$14 sps:$4 sm:$0xff]   ;;  %v1272_v3 = vld [vmem:[%s1497_s0 + $0xc] ss:$14 sps:$4 sm:$0x33]  }
  0x23   :  { %1106 = vmatprep.subr.bf16.mxu1 %v1233_v18  ;;  %v136_v50 = vpack.c.bf16 %v90_v45, %v90_v45  ;;  %v135_v51 = vpack.c.bf16 %v89_v46, %v89_v46  ;;  %v1263_v4 = vld [vmem:[#allocation2 + $0x168] sm:$0xff]   ;;  %v103_v7 = vrot.slane %v1270_v2, %v1378_v36  ;;  %v110_v8 = vrot.slane %v1272_v3, %v1378_v36  ;;  %v1265_v12 = vld [vmem:[#allocation2 + $0x170] sm:$0xff]   ;;  %v1267_v18 = vld [vmem:[#allocation2 + $0x178] sm:$0xff]  }
  0x24   :  { %1085 = vmatpush3.bf16.msra.mxu0 %v1232_v17  ;;  %v138_v56 = vpack.c.bf16 %v92_v53, %v92_v53  ;;  %v137_v57 = vpack.c.bf16 %v91_v54, %v91_v54  ;;  %v1275_v6 = vld [vmem:[%s1497_s0 + $0x28] ss:$14 sps:$4 sm:$0x33]   ;;  %v1279_v25 = vld [vmem:[%s1500_s3 + $0x18] sm:$0xff]   ;;  %v1284_v30 = vld [vmem:[%s1502_s5] sm:$0xff]  }
  0x25   :  { %1086 = vmatprep.subr.bf16.mxu0 %v1235_v20  ;;  %577 = vmatprep.mubr.bf16.mxu0 %v136_v50  ;;  %v1264_v9 = vld [vmem:[#allocation2 + $0x128] sm:$0xff]   ;;  %v124_v11 = vrot.slane %v1275_v6, %v1378_v36  ;;  %v126_v13 = vcombine.high %v103_v7, %v117_v10  ;;  %v1266_v15 = vld [vmem:[#allocation2 + $0x130] sm:$0xff]   ;;  %v1268_v20 = vld [vmem:[#allocation2 + $0x138] sm:$0xff]  }
  0x26   :  { %1107 = vmatpush3.bf16.msra.mxu1 %v1234_v19  ;;  %617 = vmatprep.mubr.bf16.mxu1 %v138_v56  ;;  %v125_v19 = vcombine.low %v103_v7, %v117_v10  ;;  %v1277_v23 = vld [vmem:[%s1500_s3 + $0x8] sm:$0xff]   ;;  %v1278_v24 = vld [vmem:[%s1500_s3 + $0x10] sm:$0xff]   ;;  %v1005_v38 = vld [vmem:[%s1499_s2] ss:$0 sm:$0xff]  ;;  %v1322_v10 = vmov 1966171168  }
  0x27   :  { %1108 = vmatprep.subr.bf16.mxu1 %v1237_v22  ;;  %v127_v14 = vcombine.low %v110_v8, %v124_v11  ;;  %v140_v16 = vpack.c.bf16 %v126_v13, %v126_v13  ;;  %v1276_v22 = vld [vmem:[%s1500_s3] sm:$0xff]   ;;  %v1289_v36 = vld [vmem:[%s1502_s5 + $0x28] sm:$0xff]   ;;  %v934_v11 = vunpack.c.l.s4 %v1322_v10 }
  0x28   :  { %1087 = vmatpush3.bf16.msra.mxu0 %v1236_v21  ;;  %v139_v21 = vpack.c.bf16 %v125_v19, %v125_v19  ;;  %v1056_v2 = vld [vmem:[%s1501_s4] ss:$0 sm:$0xff] }
  0x29   :  { %1088 = vmatprep.subr.bf16.mxu0 %v1239_v27  ;;  %v141_v17 = vpack.c.bf16 %v127_v14, %v127_v14  ;;  %v1281_v27 = vld [vmem:[%s1500_s3 + $0x28] sm:$0xff]  }
  0x2a   :  { %1109 = vmatpush3.bf16.msra.mxu1 %v1238_v26  ;;  %v1280_v26 = vld [vmem:[%s1500_s3 + $0x20] sm:$0xff]  }
  0x2b   :  { %1110 = vmatprep.subr.bf16.mxu1 %v1241_v29  ;;  %v1283_v29 = vld [vmem:[%s1500_s3 + $0x38] sm:$0xff]  }
  0x2c   :  { %1089 = vmatpush3.bf16.msra.mxu0 %v1240_v28  ;;  %v1282_v28 = vld [vmem:[%s1500_s3 + $0x30] sm:$0xff]  }
  0x2d   :  { %1090 = vmatprep.subr.bf16.mxu0 %v1243_v33  ;;  %v1286_v33 = vld [vmem:[%s1502_s5 + $0x10] sm:$0xff]  }
  0x2e   :  { %1111 = vmatpush3.bf16.msra.mxu1 %v1242_v32  ;;  %v1285_v32 = vld [vmem:[%s1502_s5 + $0x8] sm:$0xff]  }
  0x2f   :  { %1112 = vmatprep.subr.bf16.mxu1 %v1245_v35  ;;  %v1288_v35 = vld [vmem:[%s1502_s5 + $0x20] sm:$0xff]  }
  0x30   :  { %1091 = vmatpush3.bf16.msra.mxu0 %v1244_v34  ;;  %v1287_v34 = vld [vmem:[%s1502_s5 + $0x18] sm:$0xff]  }
  0x31   :  { %1120 = vmatprep.subr.bf16.mxu0 %v1251_v42 }
  0x32   :  { %1113 = vmatpush3.bf16.msra.mxu1 %v1250_v39 }
  0x33   :  { %1162 = vmatprep.subr.bf16.mxu1 %v1320_v47  ;;  %578 = vmatmul.mubr.bf16.vlgmr.msra.gmra.mrb[0].mxu0 %v135_v51 }
  0x34   :  { %1121 = vmatpush3.bf16.msra.mxu0 %v1254_v52  ;;  %657 = vmatprep.mubr.bf16.mxu0 %v140_v16 }
  0x35   :  { %1122 = vmatprep.subr.bf16.mxu0 %v1255_v55  ;;  %618 = vmatmul.mubr.bf16.vlgmr.msra.gmra.mrb[0].mxu1 %v137_v57 }
  0x36   :  { %1164 = vmatprep.mubr.msk.bf16.mxu1 %vm1321_vm0, %v1320_v47  ;;  %1163 = vmatpush3.bf16.msra.mxu1 %v1269_v0  ;;  %v1290_v0 = vld [vmem:[%s1502_s5 + $0x30] sm:$0xff]  }
  0x37   :  { %1168 = vmatprep.subr.bf16.mxu1 %v1320_v47 }
  0x38   :  { %1123 = vmatpush3.bf16.msra.mxu0 %v1256_v58 }
  0x39   :  { %1124 = vmatprep.subr.bf16.mxu0 %v1257_v59 }
  0x3c   :  { %1125 = vmatpush3.bf16.msra.mxu0 %v1258_v60 }
  0x3d   :  { %1126 = vmatprep.subr.bf16.mxu0 %v1259_v61  ;;  %1165 = vmatmul.mubr.msk.bf16.vlgmr.msra.gmra.mrb[4].mxu1 %vm541_vm1, %v141_v17 }
  0x3e   :  { %1184 = vmatprep.mubr.msk.bf16.mxu1 %vm1321_vm0, %v1320_v47  ;;  %1169 = vmatpush3.bf16.msra.mxu1 %v1276_v22 }
  0x3f   :  { %1170 = vmatprep.subr.bf16.mxu1 %v1320_v47 }
  0x40   :  { %1127 = vmatpush3.bf16.msra.mxu0 %v1260_v62 }
  0x41   :  { %1128 = vmatprep.subr.bf16.mxu0 %v1261_v63 }
  0x42   :  { %1171 = vmatpush3.bf16.msra.mxu1 %v1277_v23 }
  0x43   :  { %1172 = vmatprep.subr.bf16.mxu1 %v1320_v47 }
  0x44   :  { %1129 = vmatpush3.bf16.msra.mxu0 %v1262_v1  ;;  %v1291_v1 = vld [vmem:[%s1502_s5 + $0x38] sm:$0xff]  }
  0x45   :  { %1130 = vmatprep.subr.bf16.mxu0 %v1263_v4 }
  0x46   :  { %1173 = vmatpush3.bf16.msra.mxu1 %v1278_v24 }
  0x47   :  { %1174 = vmatprep.subr.bf16.mxu1 %v1320_v47 }
  0x48   :  { %1131 = vmatpush3.bf16.msra.mxu0 %v1264_v9 }
  0x49   :  { %1132 = vmatprep.subr.bf16.mxu0 %v1265_v12  ;;  %v1065_v12 = vld [vmem:[%s1503_s6] ss:$0 sm:$0xff] }
  0x4a   :  { %1175 = vmatpush3.bf16.msra.mxu1 %v1279_v25 }
  0x4b   :  { %1176 = vmatprep.subr.bf16.mxu1 %v1320_v47 }
  0x4c   :  { %1133 = vmatpush3.bf16.msra.mxu0 %v1266_v15 }
  0x4d   :  { %1134 = vmatprep.subr.bf16.mxu0 %v1267_v18 }
  0x4e   :  { %1177 = vmatpush3.bf16.msra.mxu1 %v1280_v26 }
  0x4f   :  { %1178 = vmatprep.subr.bf16.mxu1 %v1320_v47 }
  0x50   :  { %1135 = vmatpush3.bf16.msra.mxu0 %v1268_v20 }
  0x51   :  { %1188 = vmatprep.subr.bf16.mxu0 %v1320_v47 }
  0x52   :  { %1179 = vmatpush3.bf16.msra.mxu1 %v1281_v27 }
  0x53   :  { %658 = vmatmul.mubr.bf16.vlgmr.msra.gmra.mrb[4].mxu0 %v139_v21  ;;  %1180 = vmatprep.subr.bf16.mxu1 %v1320_v47 }
  0x54   :  { %1204 = vmatprep.mubr.msk.bf16.mxu0 %vm1321_vm0, %v1320_v47  ;;  %1189 = vmatpush3.bf16.msra.mxu0 %v1284_v30 }
  0x55   :  { %1190 = vmatprep.subr.bf16.mxu0 %v1320_v47 }
  0x56   :  { %1181 = vmatpush3.bf16.msra.mxu1 %v1282_v28 }
  0x57   :  { %1182 = vmatprep.subr.bf16.mxu1 %v1320_v47 }
  0x58   :  { %1191 = vmatpush3.bf16.msra.mxu0 %v1285_v32 }
  0x59   :  { %1192 = vmatprep.subr.bf16.mxu0 %v1320_v47 }
  0x5a   :  { %1183 = vmatpush3.bf16.msra.mxu1 %v1283_v29 }
  0x5c   :  { %1193 = vmatpush3.bf16.msra.mxu0 %v1286_v33 }
  0x5d   :  { %1194 = vmatprep.subr.bf16.mxu0 %v1320_v47 }
  0x60   :  { %1195 = vmatpush3.bf16.msra.mxu0 %v1287_v34 }
  0x61   :  { %1196 = vmatprep.subr.bf16.mxu0 %v1320_v47 }
  0x64   :  { %1197 = vmatpush3.bf16.msra.mxu0 %v1288_v35 }
  0x65   :  { %1198 = vmatprep.subr.bf16.mxu0 %v1320_v47 }
  0x68   :  { %1199 = vmatpush3.bf16.msra.mxu0 %v1289_v36 }
  0x69   :  { %1200 = vmatprep.subr.bf16.mxu0 %v1320_v47 }
  0x6c   :  { %1201 = vmatpush3.bf16.msra.mxu0 %v1290_v0 }
  0x6d   :  { %1202 = vmatprep.subr.bf16.mxu0 %v1320_v47  ;;  %v935_v47 = vunpack.c.0.s8 %v934_v11 }
  0x6f   :  { %v938_v15 = vsub.s32 %v935_v47, %v1375_v31 }
  0x70   :  { %1203 = vmatpush3.bf16.msra.mxu0 %v1291_v1 }
 0x106   :  { %v1092_v37 = vpop.f32.mrb[0].mxu0 }
 0x107   :  { %v1093_v39 = vpop.f32.mrb[1].mxu0 }
 0x108   :  { %v1094_v40 = vadd.f32 %v1093_v39, %v1092_v37  ;;  %v1095_v41 = vpop.f32.mrb[2].mxu0  ;;  %v1114_v42 = vpop.f32.mrb[0].mxu1 }
 0x109   :  { %v1096_v43 = vpop.f32.mrb[3].mxu0  ;;  %v1115_v45 = vpop.f32.mrb[1].mxu1 }
 0x10a   :  { %v580_v44 = vadd.f32 %v1094_v40, %v1005_v38  ;;  %v1116_v46 = vadd.f32 %v1115_v45, %v1114_v42  ;;  %v1117_v48 = vpop.f32.mrb[2].mxu1 }
 0x10b   :  { %v1118_v49 = vpop.f32.mrb[3].mxu1 }
 0x10c   :  { %v620_v50 = vadd.f32 %v1116_v46, %v580_v44 }
 0x110   :  { %v699_v51 = vpop.f32.mrb[4].mxu1 }
 0x111   :  { %v1166_v52 = vpop.f32.mrb[5].mxu1 }
 0x112   :  { %v702_v53 = vpop.f32.mrb[6].mxu1 }
 0x113   :  { %v1167_v54 = vpop.f32.mrb[7].mxu1 }
 0x126   :  { %v1136_v55 = vpop.f32.mrb[4].mxu0 }
 0x127   :  { %v1137_v56 = vpop.f32.mrb[5].mxu0 }
 0x128   :  { %v1138_v57 = vadd.f32 %v1137_v56, %v1136_v55  ;;  %v1139_v58 = vpop.f32.mrb[6].mxu0 }
 0x129   :  { %v1140_v59 = vpop.f32.mrb[7].mxu0 }
 0x12a   :  { %v660_v60 = vadd.f32 %v1138_v57, %v620_v50 }
 0x12c   :  { %v700_v61 = vadd.f32 %v699_v51, %v660_v60 }
 0x12e   :  { %v705_v62 = vmax.f32 %v700_v61, 0.0 }
 0x130   :  { %v706_v63 = vpack.c.bf16 %v705_v62, %v705_v62 }
 0x132   :  { %1185 = vmatmul.mubr.bf16.vlgmr.msra.gmra.mrb[8].mxu1 %v706_v63 }
 0x205   :  { %v812_v3 = vpop.f32.mrb[8].mxu1 }
 0x206   :  { %v813_v4 = vadd.f32 %v1056_v2, %v812_v3  ;;  %v1186_v5 = vpop.f32.mrb[9].mxu1 }
 0x207   :  { %v815_v6 = vpop.f32.mrb[10].mxu1 }
 0x208   :  { %v818_v7 = vmax.f32 %v813_v4, 0.0  ;;  %v1187_v8 = vpop.f32.mrb[11].mxu1 }
 0x20a   :  { %v819_v9 = vpack.c.bf16 %v818_v7, %v818_v7 }
 0x20c   :  { %1205 = vmatmul.mubr.bf16.vlgmr.msra.gmra.mrb[8].mxu0 %v819_v9 }
 0x2df   :  { %v925_v13 = vpop.f32.mrb[8].mxu0 }
 0x2e0   :  { %v926_v14 = vadd.f32 %v1065_v12, %v925_v13  ;;  %v1206_v16 = vpop.f32.mrb[9].mxu0 }
 0x2e1   :  { %v928_v17 = vpop.f32.mrb[10].mxu0 }
 0x2e2   :  { %v931_v18 = vpack.c.bf16 %v926_v14, %v926_v14  ;;  %v1207_v19 = vpop.f32.mrb[11].mxu0 }
 0x2e4   :  { %v939_v20 = vrot.slane %v931_v18, %v938_v15 }
 0x2e6   :  { %1074 = vst.sshfl [vmem:[#allocation4] sm:$0x1 pattern:$0x73625140] %v939_v20 }
 0x2ed   :  { %v982_v21 = vld [vmem:[#allocation4] sm:$0x1] }
 0x2ee   :  { %983 = vst [vmem:[%s1504_s7] sm:$0x1] %v982_v21 }
 0x2ef   :  { %1000 = vsyncpa [#allocation3], 1 }

</bundles_post_ra>
